<compile_context>
chip_gen: v5e
topology: v5e:2x2
jax: 0.10.0
libtpu: 0.0.40
codegen_flags: <defaults>
</compile_context>

<pallas_src>
import jax
import jax.numpy as jnp
from jax.experimental import pallas as pl
from jax.experimental.pallas import tpu as pltpu


# ----------------------------------------------------------------------------------
# In-kernel helpers: replicate-clamped shifts along the lane (W) and sublane (H) axes.
# ----------------------------------------------------------------------------------
def _shift_w(x, k):
    """y[..., j] = x[..., clamp(j + k, 0, W-1)]  (replicate / 'edge' behaviour)."""
    w = x.shape[-1]
    if k == 0:
        return x
    if k > 0:
        edge = x[..., w - 1:w]
        return jnp.concatenate([x[..., k:]] + [edge] * k, axis=-1)
    edge = x[..., 0:1]
    return jnp.concatenate([edge] * (-k) + [x[..., :w + k]], axis=-1)


def _shift_h(x, k):
    """y[..., i, :] = x[..., clamp(i + k, 0, H-1), :]."""
    h = x.shape[-2]
    if k == 0:
        return x
    if k > 0:
        edge = x[..., h - 1:h, :]
        return jnp.concatenate([x[..., k:, :]] + [edge] * k, axis=-2)
    edge = x[..., 0:1, :]
    return jnp.concatenate([edge] * (-k) + [x[..., :h + k, :]], axis=-2)


def _hessian_det(x):
    """det(Hessian) per pixel. x: (nb, H, W) float32 -> (nb, H, W) float32.

    Separable factors of kornia's L1-normalized 5x5 2nd-order sobel kernels:
      smooth = [1, 4, 6, 4, 1] / 8       deriv2 = [-1, 0, 2, 0, -1] / 8
      deriv1 = [1, 2, 0, -2, -1] / 6     (the horizontal dxy factor is -deriv1, but the
                                          sign cancels because only dxy**2 is used)
      GXX/64 = smooth_rows x deriv2_cols ; GYY/64 = deriv2_rows x smooth_cols
      GXY/36 = deriv1_rows x (-deriv1)_cols
    """
    # ---- horizontal (lane / W) pass: 4 clamped shifted copies shared by all filters
    l1, r1 = _shift_w(x, -1), _shift_w(x, 1)
    l2, r2 = _shift_w(x, -2), _shift_w(x, 2)
    s1, s2 = l1 + r1, l2 + r2              # symmetric sums  (|offset| 1, 2)
    d1, d2 = l1 - r1, l2 - r2              # antisymmetric differences
    h_sm = 0.75 * x + 0.5 * s1 + 0.125 * s2        # smooth_W   -> dyy path
    h_d2 = 0.25 * x - 0.125 * s2                    # deriv2_W   -> dxx path
    h_d1 = (1.0 / 3.0) * d1 + (1.0 / 6.0) * d2      # deriv1_W   -> dxy path

    # ---- vertical (sublane / H) pass, fused straight into det(H)
    a1 = _shift_h(h_d2, -1) + _shift_h(h_d2, 1)
    a2 = _shift_h(h_d2, -2) + _shift_h(h_d2, 2)
    dxx = 0.75 * h_d2 + 0.5 * a1 + 0.125 * a2       # smooth_H(deriv2_W(x))

    b2 = _shift_h(h_sm, -2) + _shift_h(h_sm, 2)     # deriv2_H has no +-1 taps
    dyy = 0.25 * h_sm - 0.125 * b2                  # deriv2_H(smooth_W(x))

    c1 = _shift_h(h_d1, -1) - _shift_h(h_d1, 1)
    c2 = _shift_h(h_d1, -2) - _shift_h(h_d1, 2)
    dxy = (1.0 / 3.0) * c1 + (1.0 / 6.0) * c2       # deriv1_H(deriv1_W(x)), up to sign

    return dxx * dyy - dxy * dxy


def _kernel_plain(x_ref, out_ref):
    det = _hessian_det(x_ref[...].astype(jnp.float32))
    out_ref[...] = det.astype(out_ref.dtype)


def _kernel_sigma(x_ref, sig4_ref, out_ref):
    det = _hessian_det(x_ref[...].astype(jnp.float32))
    out_ref[...] = (det * sig4_ref[...]).astype(out_ref.dtype)   # (nb,1,1) broadcast


# ----------------------------------------------------------------------------------
# Block sizing: based on the real VMEM footprint, not raw input bytes.
# ----------------------------------------------------------------------------------
_FOOTPRINT_TARGET = 24 << 20   # ~24 MiB live per grid step: fits v7x's 64 MiB/TC with
                               # double-buffer headroom, big enough to amortize the
                               # ~0.35us/step overhead and give efficient DMAs on v5e/v6e.
_VMEM_LIMIT = 48 << 20         # scoped VMEM limit: above v5e's 16 MiB default, below
                               # v7x's 64 MiB physical.


def _round_up(a, m):
    return (a + m - 1) // m * m


def _choose_images_per_block(n_imgs, h, w, in_itemsize, out_itemsize):
    hp, wp = _round_up(h, 8), _round_up(w, 128)      # (sublane, lane) layout padding
    tile_f32 = hp * wp * 4
    # ~10 live f32 intermediates per image at peak + double-buffered in/out DMA blocks.
    per_img = 10 * tile_f32 + 2 * hp * wp * in_itemsize + 2 * hp * wp * out_itemsize
    nb = max(1, _FOOTPRINT_TARGET // per_img)
    if n_imgs >= 4:
        nb = min(nb, n_imgs // 4)   # >= 4 grid steps: 2 per v7x TensorCore, keeps the
    elif n_imgs >= 2:               # input/output pipeline busy on every core.
        nb = min(nb, n_imgs // 2)
    return int(max(1, min(nb, n_imgs)))


# ----------------------------------------------------------------------------------
# Public wrapper (BlobHessian.forward equivalent).
# ----------------------------------------------------------------------------------
def blob_hessian(x, sigmas=None, grads_mode="sobel"):
    """Pallas TPU implementation of kornia BlobHessian.forward (grads_mode='sobel')."""
    if grads_mode != "sobel":
        # TODO(synk): grads_mode='diff' (central differences for gaussian pyramids) not implemented.
        raise NotImplementedError("only grads_mode='sobel' is implemented")
    if x.ndim != 4:
        raise ValueError(f"expected (B, C, H, W) input, got {x.shape}")

    B, C, H, W = x.shape
    N = B * C
    out_dtype = x.dtype if jnp.issubdtype(x.dtype, jnp.floating) else jnp.float32

    xr = x.reshape(N, H, W)

    nb = _choose_images_per_block(N, H, W,
                                  jnp.dtype(x.dtype).itemsize,
                                  jnp.dtype(out_dtype).itemsize)
    n_blocks = pl.cdiv(N, nb)
    Np = n_blocks * nb
    if Np != N:   # pad N instead of a divisor search (avoids nb=1 collapse for awkward N)
        xr = jnp.pad(xr, ((0, Np - N), (0, 0), (0, 0)))

    in_specs = [pl.BlockSpec((nb, H, W), lambda i: (i, 0, 0))]
    operands = [xr]
    kernel = _kernel_plain

    if sigmas is not None:
        sigmas = jnp.asarray(sigmas)
        if sigmas.ndim != 1 or sigmas.shape[0] != B:
            raise ValueError(f"Invalid sigmas shape, expected ({B},), got {sigmas.shape}")
        sig4 = jnp.repeat(sigmas.astype(jnp.float32) ** 4, C)
        if Np != N:
            sig4 = jnp.pad(sig4, (0, Np - N))
        # TODO(synk): these per-image scalars would ideally live in SMEM; a tiny (nb,1,1)
        # VMEM block is kept here for lowering robustness (one tile per step).
        in_specs.append(pl.BlockSpec((nb, 1, 1), lambda i: (i, 0, 0)))
        operands.append(sig4.reshape(Np, 1, 1))
        kernel = _kernel_sigma

    # TODO(synk): W << 128 under-fills vector lanes; packing ceil(128/W) images per lane
    # row (or pltpu.roll-based shifts when W % 128 == 0) would make compute and the output
    # store fully lane-dense, at the price of a relayout pass in the wrapper.
    # TODO(synk): single images too large for the footprint target need H-tiling with a
    # 4-row halo; current version assumes a full image fits in one block.
    out = pl.pallas_call(
        kernel,
        out_shape=jax.ShapeDtypeStruct((Np, H, W), out_dtype),
        grid=(n_blocks,),
        in_specs=in_specs,
        out_specs=pl.BlockSpec((nb, H, W), lambda i: (i, 0, 0)),
        compiler_params=pltpu.CompilerParams(
            dimension_semantics=("parallel",),
            vmem_limit_bytes=_VMEM_LIMIT,
        ),
    )(*operands)

    if Np != N:
        out = out[:N]
    return out.reshape(B, C, H, W)


# ----------------------------------------------------------------------------------
# Pure-JAX reference: dense 25-tap cross-correlation with kornia's normalized kernels
# (independent of the separable decomposition used in the Pallas kernel).
# ----------------------------------------------------------------------------------
_GXX = [
    [-1.0, 0.0, 2.0, 0.0, -1.0],
    [-4.0, 0.0, 8.0, 0.0, -4.0],
    [-6.0, 0.0, 12.0, 0.0, -6.0],
    [-4.0, 0.0, 8.0, 0.0, -4.0],
    [-1.0, 0.0, 2.0, 0.0, -1.0],
]
_GXY = [
    [-1.0, -2.0, 0.0, 2.0, 1.0],
    [-2.0, -4.0, 0.0, 4.0, 2.0],
    [0.0, 0.0, 0.0, 0.0, 0.0],
    [2.0, 4.0, 0.0, -4.0, -2.0],
    [1.0, 2.0, 0.0, -2.0, -1.0],
]
_GYY = [[_GXX[c][r] for c in range(5)] for r in range(5)]


def _filter25(xpad, k, scale, H, W):
    acc = None
    for r in range(5):
        for c in range(5):
            wgt = k[r][c] * scale
            if wgt == 0.0:
                continue
            t = wgt * xpad[..., r:r + H, c:c + W]
            acc = t if acc is None else acc + t
    return acc


def _blob_hessian_ref(x, sigmas=None):
    B, C, H, W = x.shape
    xf = x.astype(jnp.float32)
    xpad = jnp.pad(xf, ((0, 0), (0, 0), (2, 2), (2, 2)), mode="edge")
    dxx = _filter25(xpad, _GXX, 1.0 / 64.0, H, W)
    dxy = _filter25(xpad, _GXY, 1.0 / 36.0, H, W)
    dyy = _filter25(xpad, _GYY, 1.0 / 64.0, H, W)
    scores = dxx * dyy - dxy * dxy
    if sigmas is not None:
        scores = scores * (sigmas.astype(jnp.float32) ** 4)[:, None, None, None]
    return scores


if __name__ == "__main__":
    key = jax.random.PRNGKey(0)
    kx, ks = jax.random.split(key)
    B, C, H, W = 2, 4, 16, 16
    x = jax.random.normal(kx, (B, C, H, W), dtype=jnp.float32)
    sigmas = jax.random.uniform(ks, (B,), dtype=jnp.float32, minval=0.5, maxval=2.0)

    out_sig = jax.block_until_ready(blob_hessian(x, sigmas))
    out_plain = jax.block_until_ready(blob_hessian(x, None))

    ref_sig = _blob_hessian_ref(x, sigmas)
    ref_plain = _blob_hessian_ref(x, None)

    assert out_sig.shape == (B, C, H, W) and out_sig.dtype == x.dtype
    assert out_plain.shape == (B, C, H, W) and out_plain.dtype == x.dtype
    assert jnp.allclose(out_plain, ref_plain, atol=1e-4, rtol=1e-4), "mismatch (no sigmas)"
    assert jnp.allclose(out_sig, ref_sig, atol=1e-4, rtol=1e-4), "mismatch (sigmas)"

    print("KERNEL_OK")
</pallas_src>

<mosaic_0001>
module attributes {stable_mosaic.version = 11 : i64} {
  func.func @_kernel_sigma(%arg0: i32, %arg1: memref<2x16x16xf32, #tpu.memory_space<vmem>>, %arg2: memref<2x1x1xf32, #tpu.memory_space<vmem>>, %arg3: memref<2x16x16xf32, #tpu.memory_space<vmem>>) attributes {dimension_semantics = [#tpu.dimension_semantics<parallel>], iteration_bounds = array<i64: 4>, scalar_prefetch = 0 : i64, scratch_operands = 0 : i64, tpu.core_type = #tpu.core_type<tc>, window_params = [{transform_indices = @transform_0, window_bounds = array<i64: 2, 16, 16>}, {transform_indices = @transform_1, window_bounds = array<i64: 2, 1, 1>}, {transform_indices = @transform_2, window_bounds = array<i64: 2, 16, 16>}]} {
    %c0 = arith.constant 0 : index
    %c0_0 = arith.constant 0 : index
    %c0_1 = arith.constant 0 : index
    %0 = vector.load %arg1[%c0, %c0_0, %c0_1] : memref<2x16x16xf32, #tpu.memory_space<vmem>>, vector<2x16x16xf32>
    %1 = vector.extract_strided_slice %0 {offsets = [0, 0, 0], sizes = [2, 16, 1], strides = [1, 1, 1]} : vector<2x16x16xf32> to vector<2x16x1xf32>
    %2 = vector.extract_strided_slice %0 {offsets = [0, 0, 0], sizes = [2, 16, 15], strides = [1, 1, 1]} : vector<2x16x16xf32> to vector<2x16x15xf32>
    %3 = tpu.concatenate %1, %2 in 2 : vector<2x16x1xf32>, vector<2x16x15xf32> -> vector<2x16x16xf32>
    %4 = vector.extract_strided_slice %0 {offsets = [0, 0, 15], sizes = [2, 16, 1], strides = [1, 1, 1]} : vector<2x16x16xf32> to vector<2x16x1xf32>
    %5 = vector.extract_strided_slice %0 {offsets = [0, 0, 1], sizes = [2, 16, 15], strides = [1, 1, 1]} : vector<2x16x16xf32> to vector<2x16x15xf32>
    %6 = tpu.concatenate %5, %4 in 2 : vector<2x16x15xf32>, vector<2x16x1xf32> -> vector<2x16x16xf32>
    %7 = vector.extract_strided_slice %0 {offsets = [0, 0, 0], sizes = [2, 16, 1], strides = [1, 1, 1]} : vector<2x16x16xf32> to vector<2x16x1xf32>
    %8 = vector.extract_strided_slice %0 {offsets = [0, 0, 0], sizes = [2, 16, 14], strides = [1, 1, 1]} : vector<2x16x16xf32> to vector<2x16x14xf32>
    %9 = tpu.concatenate %7, %7, %8 in 2 : vector<2x16x1xf32>, vector<2x16x1xf32>, vector<2x16x14xf32> -> vector<2x16x16xf32>
    %10 = vector.extract_strided_slice %0 {offsets = [0, 0, 15], sizes = [2, 16, 1], strides = [1, 1, 1]} : vector<2x16x16xf32> to vector<2x16x1xf32>
    %11 = vector.extract_strided_slice %0 {offsets = [0, 0, 2], sizes = [2, 16, 14], strides = [1, 1, 1]} : vector<2x16x16xf32> to vector<2x16x14xf32>
    %12 = tpu.concatenate %11, %10, %10 in 2 : vector<2x16x14xf32>, vector<2x16x1xf32>, vector<2x16x1xf32> -> vector<2x16x16xf32>
    %13 = arith.addf %3, %6 : vector<2x16x16xf32>
    %14 = arith.addf %9, %12 : vector<2x16x16xf32>
    %15 = arith.subf %3, %6 : vector<2x16x16xf32>
    %16 = arith.subf %9, %12 : vector<2x16x16xf32>
    %cst = arith.constant 7.500000e-01 : f32
    %17 = vector.broadcast %cst : f32 to vector<2x16x16xf32>
    %18 = arith.mulf %17, %0 : vector<2x16x16xf32>
    %cst_2 = arith.constant 5.000000e-01 : f32
    %19 = vector.broadcast %cst_2 : f32 to vector<2x16x16xf32>
    %20 = arith.mulf %19, %13 : vector<2x16x16xf32>
    %21 = arith.addf %18, %20 : vector<2x16x16xf32>
    %cst_3 = arith.constant 1.250000e-01 : f32
    %22 = vector.broadcast %cst_3 : f32 to vector<2x16x16xf32>
    %23 = arith.mulf %22, %14 : vector<2x16x16xf32>
    %24 = arith.addf %21, %23 : vector<2x16x16xf32>
    %cst_4 = arith.constant 2.500000e-01 : f32
    %25 = vector.broadcast %cst_4 : f32 to vector<2x16x16xf32>
    %26 = arith.mulf %25, %0 : vector<2x16x16xf32>
    %cst_5 = arith.constant 1.250000e-01 : f32
    %27 = vector.broadcast %cst_5 : f32 to vector<2x16x16xf32>
    %28 = arith.mulf %27, %14 : vector<2x16x16xf32>
    %29 = arith.subf %26, %28 : vector<2x16x16xf32>
    %cst_6 = arith.constant 0.333333343 : f32
    %30 = vector.broadcast %cst_6 : f32 to vector<2x16x16xf32>
    %31 = arith.mulf %30, %15 : vector<2x16x16xf32>
    %cst_7 = arith.constant 0.166666672 : f32
    %32 = vector.broadcast %cst_7 : f32 to vector<2x16x16xf32>
    %33 = arith.mulf %32, %16 : vector<2x16x16xf32>
    %34 = arith.addf %31, %33 : vector<2x16x16xf32>
    %35 = vector.extract_strided_slice %29 {offsets = [0, 0, 0], sizes = [2, 1, 16], strides = [1, 1, 1]} : vector<2x16x16xf32> to vector<2x1x16xf32>
    %36 = vector.extract_strided_slice %29 {offsets = [0, 0, 0], sizes = [2, 15, 16], strides = [1, 1, 1]} : vector<2x16x16xf32> to vector<2x15x16xf32>
    %37 = tpu.concatenate %35, %36 in 1 : vector<2x1x16xf32>, vector<2x15x16xf32> -> vector<2x16x16xf32>
    %38 = vector.extract_strided_slice %29 {offsets = [0, 15, 0], sizes = [2, 1, 16], strides = [1, 1, 1]} : vector<2x16x16xf32> to vector<2x1x16xf32>
    %39 = vector.extract_strided_slice %29 {offsets = [0, 1, 0], sizes = [2, 15, 16], strides = [1, 1, 1]} : vector<2x16x16xf32> to vector<2x15x16xf32>
    %40 = tpu.concatenate %39, %38 in 1 : vector<2x15x16xf32>, vector<2x1x16xf32> -> vector<2x16x16xf32>
    %41 = arith.addf %37, %40 : vector<2x16x16xf32>
    %42 = vector.extract_strided_slice %29 {offsets = [0, 0, 0], sizes = [2, 1, 16], strides = [1, 1, 1]} : vector<2x16x16xf32> to vector<2x1x16xf32>
    %43 = vector.extract_strided_slice %29 {offsets = [0, 0, 0], sizes = [2, 14, 16], strides = [1, 1, 1]} : vector<2x16x16xf32> to vector<2x14x16xf32>
    %44 = tpu.concatenate %42, %42, %43 in 1 : vector<2x1x16xf32>, vector<2x1x16xf32>, vector<2x14x16xf32> -> vector<2x16x16xf32>
    %45 = vector.extract_strided_slice %29 {offsets = [0, 15, 0], sizes = [2, 1, 16], strides = [1, 1, 1]} : vector<2x16x16xf32> to vector<2x1x16xf32>
    %46 = vector.extract_strided_slice %29 {offsets = [0, 2, 0], sizes = [2, 14, 16], strides = [1, 1, 1]} : vector<2x16x16xf32> to vector<2x14x16xf32>
    %47 = tpu.concatenate %46, %45, %45 in 1 : vector<2x14x16xf32>, vector<2x1x16xf32>, vector<2x1x16xf32> -> vector<2x16x16xf32>
    %48 = arith.addf %44, %47 : vector<2x16x16xf32>
    %cst_8 = arith.constant 7.500000e-01 : f32
    %49 = vector.broadcast %cst_8 : f32 to vector<2x16x16xf32>
    %50 = arith.mulf %49, %29 : vector<2x16x16xf32>
    %cst_9 = arith.constant 5.000000e-01 : f32
    %51 = vector.broadcast %cst_9 : f32 to vector<2x16x16xf32>
    %52 = arith.mulf %51, %41 : vector<2x16x16xf32>
    %53 = arith.addf %50, %52 : vector<2x16x16xf32>
    %cst_10 = arith.constant 1.250000e-01 : f32
    %54 = vector.broadcast %cst_10 : f32 to vector<2x16x16xf32>
    %55 = arith.mulf %54, %48 : vector<2x16x16xf32>
    %56 = arith.addf %53, %55 : vector<2x16x16xf32>
    %57 = vector.extract_strided_slice %24 {offsets = [0, 0, 0], sizes = [2, 1, 16], strides = [1, 1, 1]} : vector<2x16x16xf32> to vector<2x1x16xf32>
    %58 = vector.extract_strided_slice %24 {offsets = [0, 0, 0], sizes = [2, 14, 16], strides = [1, 1, 1]} : vector<2x16x16xf32> to vector<2x14x16xf32>
    %59 = tpu.concatenate %57, %57, %58 in 1 : vector<2x1x16xf32>, vector<2x1x16xf32>, vector<2x14x16xf32> -> vector<2x16x16xf32>
    %60 = vector.extract_strided_slice %24 {offsets = [0, 15, 0], sizes = [2, 1, 16], strides = [1, 1, 1]} : vector<2x16x16xf32> to vector<2x1x16xf32>
    %61 = vector.extract_strided_slice %24 {offsets = [0, 2, 0], sizes = [2, 14, 16], strides = [1, 1, 1]} : vector<2x16x16xf32> to vector<2x14x16xf32>
    %62 = tpu.concatenate %61, %60, %60 in 1 : vector<2x14x16xf32>, vector<2x1x16xf32>, vector<2x1x16xf32> -> vector<2x16x16xf32>
    %63 = arith.addf %59, %62 : vector<2x16x16xf32>
    %cst_11 = arith.constant 2.500000e-01 : f32
    %64 = vector.broadcast %cst_11 : f32 to vector<2x16x16xf32>
    %65 = arith.mulf %64, %24 : vector<2x16x16xf32>
    %cst_12 = arith.constant 1.250000e-01 : f32
    %66 = vector.broadcast %cst_12 : f32 to vector<2x16x16xf32>
    %67 = arith.mulf %66, %63 : vector<2x16x16xf32>
    %68 = arith.subf %65, %67 : vector<2x16x16xf32>
    %69 = vector.extract_strided_slice %34 {offsets = [0, 0, 0], sizes = [2, 1, 16], strides = [1, 1, 1]} : vector<2x16x16xf32> to vector<2x1x16xf32>
    %70 = vector.extract_strided_slice %34 {offsets = [0, 0, 0], sizes = [2, 15, 16], strides = [1, 1, 1]} : vector<2x16x16xf32> to vector<2x15x16xf32>
    %71 = tpu.concatenate %69, %70 in 1 : vector<2x1x16xf32>, vector<2x15x16xf32> -> vector<2x16x16xf32>
    %72 = vector.extract_strided_slice %34 {offsets = [0, 15, 0], sizes = [2, 1, 16], strides = [1, 1, 1]} : vector<2x16x16xf32> to vector<2x1x16xf32>
    %73 = vector.extract_strided_slice %34 {offsets = [0, 1, 0], sizes = [2, 15, 16], strides = [1, 1, 1]} : vector<2x16x16xf32> to vector<2x15x16xf32>
    %74 = tpu.concatenate %73, %72 in 1 : vector<2x15x16xf32>, vector<2x1x16xf32> -> vector<2x16x16xf32>
    %75 = arith.subf %71, %74 : vector<2x16x16xf32>
    %76 = vector.extract_strided_slice %34 {offsets = [0, 0, 0], sizes = [2, 1, 16], strides = [1, 1, 1]} : vector<2x16x16xf32> to vector<2x1x16xf32>
    %77 = vector.extract_strided_slice %34 {offsets = [0, 0, 0], sizes = [2, 14, 16], strides = [1, 1, 1]} : vector<2x16x16xf32> to vector<2x14x16xf32>
    %78 = tpu.concatenate %76, %76, %77 in 1 : vector<2x1x16xf32>, vector<2x1x16xf32>, vector<2x14x16xf32> -> vector<2x16x16xf32>
    %79 = vector.extract_strided_slice %34 {offsets = [0, 15, 0], sizes = [2, 1, 16], strides = [1, 1, 1]} : vector<2x16x16xf32> to vector<2x1x16xf32>
    %80 = vector.extract_strided_slice %34 {offsets = [0, 2, 0], sizes = [2, 14, 16], strides = [1, 1, 1]} : vector<2x16x16xf32> to vector<2x14x16xf32>
    %81 = tpu.concatenate %80, %79, %79 in 1 : vector<2x14x16xf32>, vector<2x1x16xf32>, vector<2x1x16xf32> -> vector<2x16x16xf32>
    %82 = arith.subf %78, %81 : vector<2x16x16xf32>
    %cst_13 = arith.constant 0.333333343 : f32
    %83 = vector.broadcast %cst_13 : f32 to vector<2x16x16xf32>
    %84 = arith.mulf %83, %75 : vector<2x16x16xf32>
    %cst_14 = arith.constant 0.166666672 : f32
    %85 = vector.broadcast %cst_14 : f32 to vector<2x16x16xf32>
    %86 = arith.mulf %85, %82 : vector<2x16x16xf32>
    %87 = arith.addf %84, %86 : vector<2x16x16xf32>
    %88 = arith.mulf %56, %68 : vector<2x16x16xf32>
    %89 = arith.mulf %87, %87 : vector<2x16x16xf32>
    %90 = arith.subf %88, %89 : vector<2x16x16xf32>
    %c0_15 = arith.constant 0 : index
    %c0_16 = arith.constant 0 : index
    %c0_17 = arith.constant 0 : index
    %91 = vector.load %arg2[%c0_15, %c0_16, %c0_17] : memref<2x1x1xf32, #tpu.memory_space<vmem>>, vector<2x1x1xf32>
    %92 = vector.broadcast %91 : vector<2x1x1xf32> to vector<2x16x16xf32>
    %93 = arith.mulf %90, %92 : vector<2x16x16xf32>
    %c0_18 = arith.constant 0 : index
    %c0_19 = arith.constant 0 : index
    %c0_20 = arith.constant 0 : index
    %94 = vector.load %arg3[%c0_18, %c0_19, %c0_20] : memref<2x16x16xf32, #tpu.memory_space<vmem>>, vector<2x16x16xf32>
    tpu.vector_store %arg3[%c0_18, %c0_19, %c0_20], %93 {strides = array<i32>} : memref<2x16x16xf32, #tpu.memory_space<vmem>>, vector<2x16x16xf32>,
    return
  }
  func.func @transform_0(%arg0: i32) -> (i32, i32, i32) {
    %c0_i32 = arith.constant 0 : i32
    %c0_i32_0 = arith.constant 0 : i32
    %c0_i32_1 = arith.constant 0 : i32
    return %arg0, %c0_i32, %c0_i32_0 : i32, i32, i32
  }
  func.func @transform_1(%arg0: i32) -> (i32, i32, i32) {
    %c0_i32 = arith.constant 0 : i32
    %c0_i32_0 = arith.constant 0 : i32
    %c0_i32_1 = arith.constant 0 : i32
    return %arg0, %c0_i32, %c0_i32_0 : i32, i32, i32
  }
  func.func @transform_2(%arg0: i32) -> (i32, i32, i32) {
    %c0_i32 = arith.constant 0 : i32
    %c0_i32_0 = arith.constant 0 : i32
    %c0_i32_1 = arith.constant 0 : i32
    return %arg0, %c0_i32, %c0_i32_0 : i32, i32, i32
  }
}

</mosaic_0001>

<bundles_post_ra>
// kernel: tpu_custom_call.1
= control target key start
LH: loop header
LB: loop body
LE: loop exit
PB: predicated region body
PF: predicated region fallthrough
CT: control target
= control target key end

     0   :  { %7 = vsyncpa [#allocation3], 0  ;;  %s1225_s0 = inlined_call_operand.hbm [shape: f32[8,16,16], index: 0, kind: input, shape index: {}]   ;;  %s1226_s1 = inlined_call_operand.vmem [shape: f32[8,1,1], index: 1, kind: input, shape index: {}]   ;;  %s1227_s2 = inlined_call_operand.hbm [shape: f32[8,16,16], index: 2, kind: output, shape index: {}]  }
   0x1   :  { %9 = vsyncpa [#allocation3 + $0x1], 0 }
   0x2   :  { %10 = vsyncpa [#allocation4], 0 }
   0x3   :  { %12 = vsyncpa [#allocation4 + $0x1], 0  ;;  %s875_s9 = smov 0   ;;  %s877_s10 = smov 0  }
   0x4   :  { %s879_s11 = smov 0   ;;  %s881_s12 = smov 0  }
   0x5 LB: > { %s896_s13 = sadd.s32 4294967295, %s849_s12   ;;  %s672_s14 = sadd.s32 4294967294, %s849_s12   ;;  %s849_s12 = sphi %s881_s12, %s1236_s12   ;;  %s845_s11 = sphi %s879_s11, %s1235_s11   ;;  %s841_s10 = sphi %s877_s10, %s1234_s10   ;;  %s837_s9 = sphi %s875_s9, %s1233_s9  }
   0x6   : > { %s900_s15 = sadd.s32 1, %s849_s12   ;;  %s25_s16 = sadd.s32 1, %s845_s11 }
   0x7   : > { %s22_s17 = ssub.s32 %s849_s12, %s900_s15  ;;  %p32_p0 = scmp.ne.s32.totalorder %s845_s11, %s841_s10 }
   0x8   : > { %p23_p1 = scmp.eq.s32.totalorder %s22_s17, 0  ;;  %p33_p2 = scmp.eq.s32.totalorder %s849_s12, 0 }
   0x9   : > { %p38_p3 = scmp.ne.s32.totalorder %s841_s10, %s837_s9  ;;  %p39_p4 = scmp.eq.s32.totalorder %s896_s13, 0 }
   0xa   : > { %s912_s18 = scalar_select %p23_p1, %s845_s11, %s25_s16  }
   0xb   : > { %p914_p5 = por %p33_p2, %p32_p0  ;;  %p918_p6 = por %p39_p4, %p38_p3 }
   0xc   : > { %p88_p7 = scmp.eq.s32.totalorder %s896_s13, 3  ;;  %p94_p8 = scmp.eq.s32.totalorder %s672_s14, 3 }
   0xd   : > { %p705_p9 = scmp.lt.s32.totalorder %s849_s12, 4  ;;  %s114_s23 = sand.u32 1, %s845_s11  }
   0xe   : > { %p924_p10 = por %p88_p7, %p32_p0  ;;  %p928_p11 = por %p94_p8, %p38_p3 }
   0xf   : > { %s690_s24 = sshll.u32 %s849_s12, 5  ;;  %s675_s25 = sshll.u32 %s114_s23, 5 }
  0x10   : > { %s124_s28 = scalar_lea.hbm %s1225_s0, %s690_s24  ;;  %s118_s30 = scalar_lea.vmem [#allocation2], %s675_s25 }
  0x11   : > { %s125_s29 = sshll.u32 %s124_s28, 4  ;;  %s127_s3 = sshll.u32 %s118_s30, 4  ;;  %s126_s29 = int_to_ptr.hbm [resolvable:$true] %s125_s29  ;;  %s128_s3 = int_to_ptr.vmem [resolvable:$true] %s127_s3 }
  0x12   : > { %p939_p12 = pnand %p705_p9, %p914_p5  ;;  %p679_p13 = scmp.ge.s32.totalorder %s849_s12, 1 }
  0x13   : > { %p143_p0 = scmp.lt.s32.totalorder %s849_s12, 5  ;;  %s115_s5 = scalar_lea.sflag [#allocation3], %s114_s23 }
  0x14   : > { %s753_s6 = sshra.s32 %s126_s29, 4  ;;  %p757_p2 = pneg %p939_p12  ;;  %s754_s6 = int_to_ptr.hbm [resolvable:$true] %s753_s6 }
  0x15   : > { %s755_s7 = scalar_lea.hbm %s754_s6, 32  ;;  %s760_s16 = scalar_lea.hbm %s1225_s0, 128 }
  0x16   : > { %p756_p1 = scmp.ne.s32.totalorder %s754_s6, %s755_s7  ;;  %p761_p5 = scmp.lt.s32.totalorder %s754_s6, %s1225_s0 }
  0x17   : > { %p762_p7 = scmp.lt.s32.totalorder %s760_s16, %s755_s7 }
  0x18   : > { %p758_p3 = pnand %p757_p2, %p756_p1 }
  0x19   : > { %p763_p8 = por %p762_p7, %p761_p5 }
  0x1a   : > { %p759_p4 = pneg %p758_p3 }
  0x1c   : > { %p764_p9 = pnand %p763_p8, %p759_p4 }
  0x1e   : > { %767 = shalt.err (!%p764_p9)
}
  0x1f   : > { %s851_s23 = smov 128   ;;  %s852_s24 = smov 8  }
  0x20   : > { %700 = dma.hbm_to_vmem [thread:$0]  (!%p939_p12), %s126_s29, 512, %s128_s3, %s115_s5, %s851_s23, %s851_s23, %s852_s24  }
  0x21   : > { %p144_p1 = pnand %p679_p13, %p143_p0 }
  0x22   : > { %s960_s25 = sand.u32 (!%p144_p1), 1, %s841_s10  }
  0x23   : > { %147 = sbr.rel (%p144_p1) target bundleno = 252 (0xfc), region = 28  ;;  %s680_s26 = sshll.u32 (!%p144_p1), %s960_s25, 5 }
  0x24   : > { %s150_s27 = scalar_lea.sflag (!%p144_p1), [#allocation3], %s960_s25  ;;  %s153_s28 = scalar_lea.vmem (!%p144_p1), [#allocation2], %s680_s26 }
  0x28   : > { %828 = dma.done.wait (%p918_p6), %s150_s27, 512  }
  0x29   : > { %830 = vsyncadd (%p918_p6), %s150_s27, 4294966784  ;;  %s682_s29 = sshll.u32 %s896_s13, 1  ;;  %v971_v0 = vld [vmem:[%s153_s28 + $0x10] sm:$0xff]  ;;  %v973_v1 = vld [vmem:[%s153_s28] sm:$0xff]  ;;  %s853_s5 = smov 1   ;;  %v855_v4 = vmov 0  }
  0x2a   : > { %p181_p12 = scmp.lt.s32.totalorder %s682_s29, 7  ;;  %198 = vrot.lane.b32.xlu1 %v971_v0, %s853_s5  ;;  %194 = vrot.lane.b32.xlu0 %v973_v1, %s853_s5  ;;  %s854_s6 = smov 127   ;;  %v981_v2 = vld [vmem:[%s153_s28 + $0x18] sm:$0xff]  ;;  %v983_v3 = vld [vmem:[%s153_s28 + $0x8] sm:$0xff]  ;;  %vm223_vm0 = vcmask 121856   ;;  %vm206_vm1 = vcmask 7168  }
  0x2b   : > { %211 = vrot.lane.b32.xlu2 %v973_v1, %s854_s6  ;;  %748 = vset.pattern.permute.xlu1 %v855_v4  ;;  %s856_s20 = smov 126   ;;  %s857_s7 = smov 2   ;;  %vm257_vm2 = vcmask 113664   ;;  %v282_v21 = vmul.f32 0.75, %v973_v1  ;;  %v283_v22 = vmul.f32 0.75, %v983_v3  ;;  %vm240_vm3 = vcmask 15360  }
  0x2c   : > { %s1238_s29 = smov (!%p181_p12, %s682_s29), 7  ;;  %749 = vset.pattern.permute.xlu2 %v855_v4  ;;  %750 = vset.pattern.permute.xlu0 %v855_v4  ;;  %v285_v36 = vmul.f32 0.75, %v981_v2  ;;  %v284_v38 = vmul.f32 0.75, %v971_v0  ;;  %v304_v41 = vmul.f32 0.25, %v971_v0  ;;  %vm326_vm4 = vcmask 1040384   ;;  %s1164_s8 = scalar_lea.vmem [#allocation5], %s680_s26 }
  0x2d   : > { %s183_s4 = scalar_lea.vmem %s1226_s1, %s1238_s29  ;;  %v303_v48 = vmul.f32 0.25, %v983_v3  ;;  %v302_v51 = vmul.f32 0.25, %v973_v1  ;;  %v1035_v52 = vmul.f32 0.25, %v981_v2  ;;  %vm339_vm5 = vcmask 1046528   ;;  %s692_s14 = sshll.u32 %s896_s13, 5 }
  0x2e   : > { %v751_v5 = vld [vmem:[%s183_s4] ss:$0 sm:$0xff]  ;;  %v752_v6 = vld [vmem:[%s183_s4 + $0x1] ss:$0 sm:$0xff]  ;;  %vm369_vm6 = vcmask 1045504   ;;  %vm356_vm7 = vcmask 1041408   ;;  %s586_s19 = scalar_lea.hbm %s1227_s2, %s692_s14 }
  0x2f   : > { %vm568_vm8 = vcmask 130048   ;;  %s587_s23 = sshll.u32 %s1164_s8, 4  ;;  %s589_s24 = sshll.u32 %s586_s19, 4  ;;  %s588_s23 = int_to_ptr.vmem [resolvable:$true] %s587_s23  ;;  %s590_s24 = int_to_ptr.hbm [resolvable:$true] %s589_s24 }
  0x30   : > { %s574_s13 = scalar_lea.sflag [#allocation4], %s960_s25  ;;  %s797_s26 = sshra.s32 %s590_s24, 4  ;;  %s798_s26 = int_to_ptr.hbm [resolvable:$true] %s797_s26 }
  0x31   : > { %s799_s27 = scalar_lea.hbm %s798_s26, 32  ;;  %s803_s30 = scalar_lea.hbm %s1227_s2, 128 }
  0x32   : > { %200 = vrot.lane.b32.xlu1 %v981_v2, %s853_s5  ;;  %196 = vrot.lane.b32.xlu0 %v983_v3, %s853_s5  ;;  %p800_p6 = scmp.ne.s32.totalorder %s798_s26, %s799_s27  ;;  %p804_p2 = scmp.lt.s32.totalorder %s798_s26, %s1227_s2 }
  0x33   : > { %213 = vrot.lane.b32.xlu2 %v983_v3, %s854_s6  ;;  %p805_p3 = scmp.lt.s32.totalorder %s803_s30, %s799_s27 }
  0x34   : > { %p801_p13 = pnand %p800_p6, %p924_p10 }
  0x35   : > { %p806_p4 = por %p805_p3, %p804_p2 }
  0x36   : > { %p802_p0 = pneg %p801_p13 }
  0x38   : > { %p807_p5 = pnand %p806_p4, %p802_p0 }
  0x3a   : > { %217 = vrot.lane.b32.xlu1 %v981_v2, %s854_s6  ;;  %215 = vrot.lane.b32.xlu0 %v971_v0, %s854_s6 }
  0x3b   : > { %245 = vrot.lane.b32.xlu2 %v973_v1, %s856_s20 }
  0x42   : > { %249 = vrot.lane.b32.xlu1 %v971_v0, %s856_s20  ;;  %247 = vrot.lane.b32.xlu0 %v983_v3, %s856_s20 }
  0x43   : > { %251 = vrot.lane.b32.xlu2 %v981_v2, %s856_s20 }
  0x4a   : > { %230 = vrot.lane.b32.xlu1 %v983_v3, %s857_s7  ;;  %228 = vrot.lane.b32.xlu0 %v973_v1, %s857_s7 }
  0x4b   : > { %232 = vrot.lane.b32.xlu2 %v971_v0, %s857_s7 }
  0x52   : > { %234 = vrot.lane.b32.xlu0 %v981_v2, %s857_s7  ;;  %557 = vperm.xlu1 %748, %v751_v5  }
  0x53   : > { %561 = vperm.xlu2 %749, %v752_v6  }
  0x85   : > { %v212_v7 = vpop.permute.xlu2 %211 }
  0x86   : > { %v224_v17 = vsel %vm223_vm0, %v212_v7, %v973_v1 }
  0x8d   : > { %v214_v8 = vpop.permute.xlu2 %213 }
  0x8e   : > { %v225_v24 = vsel %vm223_vm0, %v214_v8, %v983_v3 }
  0x95   : > { %v246_v11 = vpop.permute.xlu2 %245 }
  0x96   : > { %v258_v25 = vsel %vm257_vm2, %v246_v11, %v212_v7 }
  0x97   : > { %v262_v44 = vsel %vm223_vm0, %v258_v25, %v973_v1 }
  0x9c   : > { %v199_v9 = vpop.permute.xlu1 %198  ;;  %v195_v10 = vpop.permute.xlu0 %194 }
  0x9d   : > { %v252_v14 = vpop.permute.xlu2 %251  ;;  %v207_v18 = vsel %vm206_vm1, %v973_v1, %v195_v10  ;;  %v209_v20 = vsel %vm206_vm1, %v971_v0, %v199_v9 }
  0x9e   : > { %v266_v19 = vadd.f32 %v224_v17, %v207_v18  ;;  %v274_v26 = vsub.f32 %v207_v18, %v224_v17 }
  0xa0   : > { %v286_v34 = vmul.f32 0.5, %v266_v19  ;;  %v1029_v45 = vmul.f32 0.33333334, %v274_v26 }
  0xa2   : > { %v290_v49 = vadd.f32 %v286_v34, %v282_v21 }
  0xa4   : > { %v201_v12 = vpop.permute.xlu1 %200  ;;  %v197_v13 = vpop.permute.xlu0 %196 }
  0xa5   : > { %v233_v23 = vpop.permute.xlu2 %232  ;;  %v1013_v30 = vsel %vm206_vm1, %v981_v2, %v201_v12  ;;  %v208_v31 = vsel %vm206_vm1, %v983_v3, %v197_v13 }
  0xa6   : > { %v243_v35 = vsel %vm240_vm3, %v209_v20, %v233_v23  ;;  %v267_v42 = vadd.f32 %v225_v24, %v208_v31  ;;  %v275_v53 = vsub.f32 %v208_v31, %v225_v24 }
  0xa8   : > { %v287_v57 = vmul.f32 0.5, %v267_v42  ;;  %v311_v7 = vmul.f32 0.33333334, %v275_v53 }
  0xaa   : > { %v291_v11 = vadd.f32 %v287_v57, %v283_v22 }
  0xac   : > { %v218_v15 = vpop.permute.xlu1 %217  ;;  %v216_v16 = vpop.permute.xlu0 %215 }
  0xad   : > { %v226_v27 = vsel %vm223_vm0, %v216_v16, %v971_v0  ;;  %v227_v32 = vsel %vm223_vm0, %v218_v15, %v981_v2  ;;  %v261_v58 = vsel %vm257_vm2, %v252_v14, %v218_v15 }
  0xae   : > { %v268_v39 = vadd.f32 %v226_v27, %v209_v20  ;;  %v269_v43 = vadd.f32 %v227_v32, %v1013_v30  ;;  %v276_v54 = vsub.f32 %v209_v20, %v226_v27  ;;  %v277_v59 = vsub.f32 %v1013_v30, %v227_v32 }
  0xaf   : > { %v1048_v14 = vsel %vm223_vm0, %v261_v58, %v981_v2 }
  0xb0   : > { %v288_v55 = vmul.f32 0.5, %v268_v39  ;;  %v289_v60 = vmul.f32 0.5, %v269_v43  ;;  %v312_v9 = vmul.f32 0.33333334, %v276_v54  ;;  %v1052_v15 = vmul.f32 0.33333334, %v277_v59 }
  0xb4   : > { %v250_v28 = vpop.permute.xlu1 %249  ;;  %v248_v29 = vpop.permute.xlu0 %247 }
  0xb5   : > { %v260_v33 = vsel %vm257_vm2, %v250_v28, %v216_v16  ;;  %v259_v50 = vsel %vm257_vm2, %v248_v29, %v214_v8  ;;  %v292_v8 = vadd.f32 %v288_v55, %v284_v38 }
  0xb6   : > { %v264_v37 = vsel %vm223_vm0, %v260_v33, %v971_v0  ;;  %v263_v1 = vsel %vm223_vm0, %v259_v50, %v983_v3  ;;  %v1050_v3 = vadd.f32 %v289_v60, %v285_v36 }
  0xb7   : > { %v272_v40 = vadd.f32 %v264_v37, %v243_v35  ;;  %v280_v46 = vsub.f32 %v243_v35, %v264_v37 }
  0xb9   : > { %v296_v47 = vmul.f32 0.125, %v272_v40  ;;  %v316_v63 = vmul.f32 0.16666667, %v280_v46 }
  0xbb   : > { %v1037_v56 = vsub.f32 %v304_v41, %v296_v47  ;;  %v1054_v16 = vadd.f32 %v296_v47, %v292_v8  ;;  %v1056_v17 = vadd.f32 %v316_v63, %v312_v9 }
  0xbc   : > { %v231_v61 = vpop.permute.xlu1 %230  ;;  %v229_v62 = vpop.permute.xlu0 %228 }
  0xbd   : > { %v242_v0 = vsel %vm240_vm3, %v208_v31, %v231_v61  ;;  %v241_v4 = vsel %vm240_vm3, %v207_v18, %v229_v62  ;;  %v330_v10 = vrot.slane %v1037_v56, 7  ;;  %v343_v21 = vrot.slane %v1037_v56, 1 }
  0xbe   : > { %v271_v5 = vadd.f32 %v263_v1, %v242_v0  ;;  %v270_v6 = vadd.f32 %v262_v44, %v241_v4  ;;  %v279_v18 = vsub.f32 %v242_v0, %v263_v1  ;;  %v278_v20 = vsub.f32 %v241_v4, %v262_v44 }
  0xbf   : > { %v1063_v2 = vsel %vm326_vm4, %v1037_v56, %v330_v10  ;;  %v360_v23 = vrot.slane %v1037_v56, 6  ;;  %v373_v24 = vrot.slane %v1037_v56, 2  ;;  %v411_v60 = vrot.slane %v1054_v16, 7 }
  0xc0   : > { %v295_v12 = vmul.f32 0.125, %v271_v5  ;;  %v294_v13 = vmul.f32 0.125, %v270_v6  ;;  %v315_v35 = vmul.f32 0.16666667, %v279_v18  ;;  %v314_v36 = vmul.f32 0.16666667, %v278_v20 }
  0xc1   : > { %v1088_v55 = vsel %vm356_vm7, %v1063_v2, %v360_v23 }
  0xc2   : > { %v307_v19 = vsub.f32 %v303_v48, %v295_v12  ;;  %v306_v22 = vsub.f32 %v302_v51, %v294_v13  ;;  %v1077_v43 = vadd.f32 %v295_v12, %v291_v11  ;;  %v318_v57 = vadd.f32 %v314_v36, %v1029_v45 }
  0xc3   : > { %v319_v1 = vadd.f32 %v315_v35, %v311_v7 }
  0xc4   : > { %v235_v25 = vpop.permute.xlu0 %234  ;;  %v328_v26 = vrot.slane %v307_v19, 7  ;;  %v341_v27 = vrot.slane %v307_v19, 1  ;;  %v358_v28 = vrot.slane %v307_v19, 6  ;;  %v371_v29 = vrot.slane %v307_v19, 2 }
  0xc5   : > { %v1069_v31 = vsel %vm240_vm3, %v1013_v30, %v235_v25  ;;  %v327_v32 = vrot.slane %v306_v22, 7  ;;  %v340_v33 = vrot.slane %v306_v22, 1  ;;  %v357_v34 = vrot.slane %v306_v22, 6 }
  0xc6   : > { %v273_v37 = vadd.f32 %v1048_v14, %v1069_v31  ;;  %v370_v38 = vrot.slane %v306_v22, 2  ;;  %v350_v42 = vsel %vm339_vm5, %v341_v27, %v307_v19  ;;  %v298_v30 = vadd.f32 %v294_v13, %v290_v49 }
  0xc7   : > { %v329_v39 = vsel %vm326_vm4, %v327_v32, %v328_v26  ;;  %v337_v40 = vsel %vm326_vm4, %v306_v22, %v327_v32  ;;  %v342_v41 = vsel %vm339_vm5, %v340_v33, %v341_v27  ;;  %v359_v46 = vsel %vm356_vm7, %v357_v34, %v358_v28 }
  0xc8   : > { %v352_v44 = vadd.f32 %v342_v41, %v337_v40  ;;  %v297_v47 = vmul.f32 0.125, %v273_v37  ;;  %v367_v48 = vsel %vm356_vm7, %v337_v40, %v357_v34  ;;  %v372_v50 = vsel %vm369_vm6, %v370_v38, %v371_v29 }
  0xc9   : > { %v380_v51 = vsel %vm369_vm6, %v371_v29, %v341_v27  ;;  %v353_v53 = vadd.f32 %v350_v42, %v329_v39  ;;  %v1091_v49 = vmul.f32 0.75, %v1037_v56  ;;  %v384_v58 = vadd.f32 %v372_v50, %v367_v48 }
  0xca   : > { %v382_v54 = vsel %vm339_vm5, %v380_v51, %v307_v19  ;;  %v392_v59 = vmul.f32 0.5, %v352_v44  ;;  %v410_v62 = vrot.slane %v298_v30, 7  ;;  %v416_v63 = vrot.slane %v298_v30, 6 }
  0xcb   : > { %v385_v61 = vadd.f32 %v382_v54, %v359_v46  ;;  %v417_v0 = vrot.slane %v1077_v43, 6  ;;  %v1097_v4 = vsub.f32 %v1035_v52, %v297_v47  ;;  %v388_v5 = vmul.f32 0.75, %v306_v22 }
  0xcc   : > { %v430_v6 = vrot.slane %v298_v30, 2  ;;  %v389_v8 = vmul.f32 0.75, %v307_v19  ;;  %v393_v9 = vmul.f32 0.5, %v353_v53  ;;  %v426_v11 = vsel %vm326_vm4, %v298_v30, %v410_v62 }
  0xcd   : > { %v431_v45 = vrot.slane %v1077_v43, 2  ;;  %v396_v12 = vadd.f32 %v392_v59, %v388_v5  ;;  %v400_v13 = vmul.f32 0.125, %v384_v58  ;;  %v428_v18 = vsel %vm356_vm7, %v426_v11, %v416_v63 }
  0xce   : > { %v440_v20 = vrot.slane %v1077_v43, 1  ;;  %v401_v25 = vmul.f32 0.125, %v385_v61  ;;  %v418_v7 = vsel %vm356_vm7, %v416_v63, %v417_v0  ;;  %v468_v26 = vrot.slane %v318_v57, 7 }
  0xcf   : > { %v432_v52 = vsel %vm369_vm6, %v430_v6, %v431_v45  ;;  %v469_v27 = vrot.slane %v319_v1, 7  ;;  %v480_v28 = vrot.slane %v318_v57, 1  ;;  %v481_v33 = vrot.slane %v319_v1, 1 }
  0xd0   : > { %v444_v22 = vsel %vm369_vm6, %v431_v45, %v440_v20  ;;  %v448_v19 = vadd.f32 %v432_v52, %v428_v18  ;;  %v478_v32 = vsel %vm326_vm4, %v318_v57, %v468_v26  ;;  %v496_v34 = vrot.slane %v318_v57, 6 }
  0xd1   : > { %v446_v29 = vsel %vm339_vm5, %v444_v22, %v1077_v43  ;;  %v397_v35 = vadd.f32 %v393_v9, %v389_v8  ;;  %v470_v37 = vsel %vm326_vm4, %v468_v26, %v469_v27  ;;  %v497_v38 = vrot.slane %v319_v1, 6 }
  0xd2   : > { %v449_v36 = vadd.f32 %v446_v29, %v418_v7  ;;  %v281_v39 = vsub.f32 %v1069_v31, %v1048_v14  ;;  %v482_v40 = vsel %vm339_vm5, %v480_v28, %v481_v33  ;;  %v490_v41 = vsel %vm339_vm5, %v481_v33, %v319_v1 }
  0xd3   : > { %v508_v42 = vrot.slane %v318_v57, 2  ;;  %v1115_v44 = vadd.f32 %v297_v47, %v1050_v3  ;;  %v456_v46 = vmul.f32 0.125, %v448_v19  ;;  %v492_v48 = vsub.f32 %v478_v32, %v482_v40 }
  0xd4   : > { %v506_v50 = vsel %vm356_vm7, %v478_v32, %v496_v34  ;;  %v457_v51 = vmul.f32 0.125, %v449_v36  ;;  %v493_v53 = vsub.f32 %v470_v37, %v490_v41  ;;  %v509_v54 = vrot.slane %v319_v1, 2 }
  0xd5   : > { %v344_v58 = vrot.slane %v1097_v4, 1  ;;  %v404_v59 = vadd.f32 %v400_v13, %v396_v12  ;;  %v405_v61 = vadd.f32 %v401_v25, %v397_v35  ;;  %v452_v14 = vmul.f32 0.25, %v298_v30 }
  0xd6   : > { %v498_v31 = vsel %vm356_vm7, %v496_v34, %v497_v38  ;;  %v453_v62 = vmul.f32 0.25, %v1077_v43  ;;  %v510_v57 = vsel %vm369_vm6, %v508_v42, %v509_v54  ;;  %v518_v3 = vsel %vm369_vm6, %v509_v54, %v481_v33  ;;  %v558_v34 = vpop.permute.xlu1 %557 }
  0xd7   : > { %v331_v47 = vrot.slane %v1097_v4, 7  ;;  %v460_v63 = vsub.f32 %v452_v14, %v456_v46  ;;  %v520_v0 = vsel %vm339_vm5, %v518_v3, %v319_v1  ;;  %v522_v5 = vsub.f32 %v506_v50, %v510_v57 }
  0xd8   : > { %v526_v6 = vmul.f32 0.33333334, %v492_v48  ;;  %v461_v8 = vsub.f32 %v453_v62, %v457_v51  ;;  %v523_v9 = vsub.f32 %v498_v31, %v520_v0  ;;  %v527_v11 = vmul.f32 0.33333334, %v493_v53 }
  0xd9   : > { %v345_v30 = vsel %vm339_vm5, %v343_v21, %v344_v58  ;;  %v317_v43 = vmul.f32 0.16666667, %v281_v39  ;;  %v530_v45 = vmul.f32 0.16666667, %v522_v5  ;;  %v374_v12 = vrot.slane %v1097_v4, 2 }
  0xda   : > { %v419_v13 = vrot.slane %v1054_v16, 6  ;;  %v531_v18 = vmul.f32 0.16666667, %v523_v9  ;;  %v332_v1 = vsel %vm326_vm4, %v330_v10, %v331_v47  ;;  %v351_v20 = vsel %vm339_vm5, %v344_v58, %v1097_v4 }
  0xdb   : > { %v433_v25 = vrot.slane %v1054_v16, 2  ;;  %v534_v7 = vadd.f32 %v530_v45, %v526_v6  ;;  %v538_v52 = vmul.f32 %v460_v63, %v404_v59  ;;  %v354_v21 = vadd.f32 %v345_v30, %v1063_v2 }
  0xdc   : > { %v361_v26 = vrot.slane %v1097_v4, 6  ;;  %v535_v22 = vadd.f32 %v531_v18, %v527_v11  ;;  %v539_v19 = vmul.f32 %v461_v8, %v405_v61  ;;  %v381_v27 = vsel %vm369_vm6, %v374_v12, %v344_v58 }
  0xdd   : > { %v420_v28 = vrot.slane %v1115_v44, 6  ;;  %v321_v29 = vadd.f32 %v317_v43, %v1052_v15  ;;  %v542_v10 = vmul.f32 %v534_v7, %v534_v7  ;;  %v355_v32 = vadd.f32 %v351_v20, %v332_v1 }
  0xde   : > { %v427_v33 = vsel %vm326_vm4, %v1054_v16, %v411_v60  ;;  %v543_v35 = vmul.f32 %v535_v22, %v535_v22  ;;  %v391_v2 = vmul.f32 0.75, %v1097_v4  ;;  %v434_v36 = vrot.slane %v1115_v44, 2 }
  0xdf   : > { %v441_v37 = vrot.slane %v1115_v44, 1  ;;  %v546_v38 = vsub.f32 %v538_v52, %v542_v10  ;;  %v362_v15 = vsel %vm356_vm7, %v360_v23, %v361_v26  ;;  %v383_v39 = vsel %vm339_vm5, %v381_v27, %v1097_v4 }
  0xe0   : > { %v394_v40 = vmul.f32 0.5, %v354_v21  ;;  %v547_v41 = vsub.f32 %v539_v19, %v543_v35  ;;  %v375_v60 = vsel %vm369_vm6, %v373_v24, %v374_v12  ;;  %v421_v42 = vsel %vm356_vm7, %v419_v13, %v420_v28  ;;  %v562_v35 = vpop.permute.xlu2 %561 }
  0xe1   : > { %v445_v46 = vsel %vm369_vm6, %v434_v36, %v441_v37  ;;  %v564_v48 = vmul.f32 %v558_v34, %v546_v38  ;;  %v435_v50 = vsel %vm369_vm6, %v433_v25, %v434_v36  ;;  %v471_v23 = vrot.slane %v1056_v17, 7 }
  0xe2   : > { %v447_v51 = vsel %vm339_vm5, %v445_v46, %v1115_v44  ;;  %v565_v53 = vmul.f32 %v558_v34, %v547_v41  ;;  %v387_v4 = vadd.f32 %v383_v39, %v362_v15  ;;  %v395_v54 = vmul.f32 0.5, %v355_v32 }
  0xe3   : > { %v472_v58 = vrot.slane %v321_v29, 7  ;;  %569 = vst.msk [vmem:[%s1164_s8] sm:$0xff] %vm568_vm8, %v564_v48  ;;  %v429_v56 = vsel %vm356_vm7, %v427_v33, %v419_v13  ;;  %v451_v24 = vadd.f32 %v447_v51, %v421_v42  ;;  %v483_v59 = vrot.slane %v1056_v17, 1 }
  0xe4   : > { %v484_v61 = vrot.slane %v321_v29, 1  ;;  %570 = vst.msk [vmem:[%s1164_s8 + $0x8] sm:$0xff] %vm568_vm8, %v565_v53  ;;  %v386_v14 = vadd.f32 %v375_v60, %v1088_v55  ;;  %v450_v31 = vadd.f32 %v435_v50, %v429_v56  ;;  %v500_v57 = vrot.slane %v321_v29, 6 }
  0xe5   : > { %v473_v62 = vsel %vm326_vm4, %v471_v23, %v472_v58  ;;  %v479_v3 = vsel %vm326_vm4, %v1056_v17, %v471_v23  ;;  %v499_v0 = vrot.slane %v1056_v17, 6  ;;  %v398_v5 = vadd.f32 %v394_v40, %v1091_v49 }
  0xe6   : > { %v485_v47 = vsel %vm339_vm5, %v483_v59, %v484_v61  ;;  %v491_v63 = vsel %vm339_vm5, %v484_v61, %v321_v29  ;;  %v399_v6 = vadd.f32 %v395_v54, %v391_v2  ;;  %v403_v8 = vmul.f32 0.125, %v387_v4 }
  0xe7   : > { %v494_v9 = vsub.f32 %v479_v3, %v485_v47  ;;  %v459_v11 = vmul.f32 0.125, %v451_v24  ;;  %v495_v55 = vsub.f32 %v473_v62, %v491_v63  ;;  %v511_v30 = vrot.slane %v1056_v17, 2 }
  0xe8   : > { %v512_v43 = vrot.slane %v321_v29, 2  ;;  %v402_v45 = vmul.f32 0.125, %v386_v14  ;;  %v454_v12 = vmul.f32 0.25, %v1054_v16  ;;  %v458_v13 = vmul.f32 0.125, %v450_v31 }
  0xe9   : > { %v501_v18 = vsel %vm356_vm7, %v499_v0, %v500_v57  ;;  %v455_v1 = vmul.f32 0.25, %v1115_v44  ;;  %v507_v20 = vsel %vm356_vm7, %v479_v3, %v499_v0  ;;  %v528_v21 = vmul.f32 0.33333334, %v494_v9 }
  0xea   : > { %v513_v49 = vsel %vm369_vm6, %v511_v30, %v512_v43  ;;  %v519_v25 = vsel %vm369_vm6, %v512_v43, %v484_v61  ;;  %v406_v7 = vadd.f32 %v402_v45, %v398_v5  ;;  %v407_v26 = vadd.f32 %v403_v8, %v399_v6 }
  0xeb   : > { %v521_v52 = vsel %vm339_vm5, %v519_v25, %v321_v29  ;;  %v524_v17 = vsub.f32 %v507_v20, %v513_v49  ;;  %v463_v16 = vsub.f32 %v455_v1, %v459_v11  ;;  %v529_v19 = vmul.f32 0.33333334, %v495_v55 }
  0xec   : > { %v525_v22 = vsub.f32 %v501_v18, %v521_v52  ;;  %v462_v27 = vsub.f32 %v454_v12, %v458_v13 }
  0xed   : > { %v532_v28 = vmul.f32 0.16666667, %v524_v17  ;;  %v541_v34 = vmul.f32 %v463_v16, %v407_v26 }
  0xee   : > { %v533_v44 = vmul.f32 0.16666667, %v525_v22  ;;  %v540_v32 = vmul.f32 %v462_v27, %v406_v7 }
  0xef   : > { %v536_v10 = vadd.f32 %v532_v28, %v528_v21 }
  0xf0   : > { %v537_v33 = vadd.f32 %v533_v44, %v529_v19 }
  0xf1   : > { %v544_v29 = vmul.f32 %v536_v10, %v536_v10 }
  0xf2   : > { %v545_v2 = vmul.f32 %v537_v33, %v537_v33 }
  0xf3   : > { %v548_v36 = vsub.f32 %v540_v32, %v544_v29 }
  0xf4   : > { %v549_v37 = vsub.f32 %v541_v34, %v545_v2 }
  0xf5   : > { %v566_v38 = vmul.f32 %v562_v35, %v548_v36 }
  0xf6   : > { %v567_v15 = vmul.f32 %v562_v35, %v549_v37 }
  0xf7   : > { %571 = vst.msk [vmem:[%s1164_s8 + $0x10] sm:$0xff] %vm568_vm8, %v566_v38 }
  0xf8   : > { %572 = vst.msk [vmem:[%s1164_s8 + $0x18] sm:$0xff] %vm568_vm8, %v567_v15 }
  0xf9   : > { %810 = shalt.err (!%p807_p5)
}
  0xfa   : > { %s858_s25 = smov 128   ;;  %s859_s5 = smov 8  }
  0xfb   : > { %695 = dma.vmem_to_hbm [thread:$0]  (%p924_p10), %s588_s23, 512, %s590_s24, %s574_s13, %s858_s25, %s858_s25, %s859_s5  }
  0xfc PF: > { %p706_p7 = scmp.ge.s32.totalorder %s849_s12, 2  ;;  %s604_s6 = sand.u32 1, %s837_s9  }
  0xfd   : > { %s605_s20 = scalar_lea.sflag [#allocation4], %s604_s6 }
  0xfe   : > { %p702_p8 = pnand %p706_p7, %p928_p11 }
 0x100   : > { %p703_p9 = pneg %p702_p8 }
 0x102   : > { %832 = dma.done.wait (%p703_p9), %s605_s20, 512  }
 0x103   : > { %834 = vsyncadd (%p703_p9), %s605_s20, 4294966784  ;;  %p15_p1 = scmp.ge.s32.totalorder %s900_s15, 6   ;;  %s1233_s9 = smov %s841_s10 }
 0x104   : > { %s1234_s10 = smov %s845_s11  ;;  %s1235_s11 = smov %s912_s18 }
 0x105   : > { %s1236_s12 = smov %s900_s15  ;;  %17 = sbr.rel (!%p15_p1) target bundleno = 5 (0x5), region = 76 }
 0x10a   :  { %611 = vsyncpa [#allocation3], 1 }
 0x10b   :  { %613 = vsyncpa [#allocation3 + $0x1], 1 }
 0x10c   :  { %614 = vsyncpa [#allocation4], 1 }
 0x10d   :  { %616 = vsyncpa [#allocation4 + $0x1], 1 }

</bundles_post_ra>
